<compile_context>
chip_gen: v5e
topology: v5e:2x2
jax: 0.10.0
libtpu: 0.0.40
codegen_flags: <defaults>
</compile_context>

<pallas_src>
import jax
import jax.numpy as jnp
from jax.experimental import pallas as pl
from jax.experimental.pallas import tpu as pltpu


def ann_kernel(x_ref, w1_ref, st1_ref, w2_ref, st2_ref, b3_ref, o_ref):
    """relu((x@W1)*s1 + t1) -> relu((.@W2)*s2 + t2) -> sum(. * w3) + b3."""
    x = x_ref[...]                                                   # (TB, IN) bf16

    # fc1 + folded bn1 + relu1   (dropout1 identity in eval mode)
    h1 = jnp.dot(x, w1_ref[...], preferred_element_type=jnp.float32)  # (TB, H1) f32
    h1 = h1 * st1_ref[0:1, :] + st1_ref[1:2, :]
    h1 = jnp.maximum(h1, 0.0)
    # TODO(synk): training-mode dropout (rate=0.5) not implemented; eval-mode identity.

    # fc2 + folded bn2 + relu2   (dropout2 identity in eval mode)
    h2 = jnp.dot(h1.astype(jnp.bfloat16), w2_ref[...],
                 preferred_element_type=jnp.float32)                  # (TB, H2) f32
    h2 = h2 * st2_ref[0:1, :] + st2_ref[1:2, :]
    h2 = jnp.maximum(h2, 0.0)

    # fc3 (out_dim = 1): VPU multiply + XLU lane reduce instead of a 1-column
    # MXU matmul; bias comes from SMEM as a scalar.
    out = jnp.sum(h2 * st2_ref[2:3, :], axis=-1, keepdims=True) + b3_ref[0, 0]
    o_ref[...] = out.astype(o_ref.dtype)


def _round_up(n, m):
    return ((n + m - 1) // m) * m


def ann_forward(x, params, tb=2048):
    """Fold BN stats + biases into scale/shift, tile the batch, run the fused kernel."""
    (w1, b1, g1, beta1, rm1, rv1,
     w2, b2, g2, beta2, rm2, rv2,
     w3, b3) = params
    eps = 1e-5

    # Fold BN:  gamma*(z - mean)/sqrt(var+eps) + beta,  z = xW + b
    #        =  (xW)*scale + ((b - mean)*scale + beta)
    s1 = g1 / jnp.sqrt(rv1 + eps)
    t1 = (b1 - rm1) * s1 + beta1
    s2 = g2 / jnp.sqrt(rv2 + eps)
    t2 = (b2 - rm2) * s2 + beta2

    st1 = jnp.stack([s1, t1], axis=0).astype(jnp.float32)             # (2, H1)
    st2 = jnp.stack([s2, t2, w3[:, 0]], axis=0).astype(jnp.float32)   # (3, H2)
    b3r = b3.reshape(1, 1).astype(jnp.float32)                        # (1, 1) scalar (SMEM)

    B, IN = x.shape
    H1 = w1.shape[1]
    H2 = w2.shape[1]

    # bf16 inputs/weights: halve the dominant HBM stream, native MXU rate.
    xb = x.astype(jnp.bfloat16)
    w1b = w1.astype(jnp.bfloat16)
    w2b = w2.astype(jnp.bfloat16)

    # Batch tile: large blocks amortize per-step overhead; TB kept modest
    # enough for v7x's smaller VMEM.  Pad B up to a multiple of TB.
    TB = min(int(tb), _round_up(B, 16))
    TB = _round_up(TB, 16)
    Bp = _round_up(B, TB)
    if Bp != B:
        xb = jnp.pad(xb, ((0, Bp - B), (0, 0)))
    grid = (Bp // TB,)

    out = pl.pallas_call(
        ann_kernel,
        out_shape=jax.ShapeDtypeStruct((Bp, 1), jnp.float32),
        grid=grid,
        in_specs=[
            pl.BlockSpec((TB, IN), lambda i: (i, 0)),     # x: streamed per tile
            pl.BlockSpec((IN, H1), lambda i: (0, 0)),     # W1: resident
            pl.BlockSpec((2, H1), lambda i: (0, 0)),      # [s1; t1]: resident
            pl.BlockSpec((H1, H2), lambda i: (0, 0)),     # W2: resident
            pl.BlockSpec((3, H2), lambda i: (0, 0)),      # [s2; t2; w3]: resident
            pl.BlockSpec(memory_space=pltpu.MemorySpace.SMEM),  # b3 scalar
        ],
        out_specs=pl.BlockSpec((TB, 1), lambda i: (i, 0)),
        compiler_params=pltpu.CompilerParams(
            dimension_semantics=("parallel",),
        ),
    )(xb, w1b, st1, w2b, st2, b3r)

    return out[:B]


def init_params(key, input_dim, hidden_dim1=64, hidden_dim2=32):
    ks = jax.random.split(key, 6)
    # fc weights stored as (in, out)
    w1 = jax.random.normal(ks[0], (input_dim, hidden_dim1), jnp.float32) * 0.1
    b1 = jax.random.normal(ks[1], (hidden_dim1,), jnp.float32) * 0.1
    w2 = jax.random.normal(ks[2], (hidden_dim1, hidden_dim2), jnp.float32) * 0.1
    b2 = jax.random.normal(ks[3], (hidden_dim2,), jnp.float32) * 0.1
    w3 = jax.random.normal(ks[4], (hidden_dim2, 1), jnp.float32) * 0.1
    b3 = jax.random.normal(ks[5], (1,), jnp.float32) * 0.1
    # BatchNorm1d default init: gamma=1, beta=0, running_mean=0, running_var=1
    g1 = jnp.ones((hidden_dim1,), jnp.float32)
    beta1 = jnp.zeros((hidden_dim1,), jnp.float32)
    rm1 = jnp.zeros((hidden_dim1,), jnp.float32)
    rv1 = jnp.ones((hidden_dim1,), jnp.float32)
    g2 = jnp.ones((hidden_dim2,), jnp.float32)
    beta2 = jnp.zeros((hidden_dim2,), jnp.float32)
    rm2 = jnp.zeros((hidden_dim2,), jnp.float32)
    rv2 = jnp.ones((hidden_dim2,), jnp.float32)
    return (w1, b1, g1, beta1, rm1, rv1,
            w2, b2, g2, beta2, rm2, rv2,
            w3, b3)


def reference_forward(x, params):
    """Pure-JAX f32 reference of the PyTorch eval-mode forward."""
    (w1, b1, g1, beta1, rm1, rv1,
     w2, b2, g2, beta2, rm2, rv2,
     w3, b3) = params
    eps = 1e-5
    h = x @ w1 + b1
    h = (h - rm1) / jnp.sqrt(rv1 + eps) * g1 + beta1
    h = jnp.maximum(h, 0.0)
    h = h @ w2 + b2
    h = (h - rm2) / jnp.sqrt(rv2 + eps) * g2 + beta2
    h = jnp.maximum(h, 0.0)
    return h @ w3 + b3


if __name__ == "__main__":
    key = jax.random.PRNGKey(0)
    k_x, k_x2, k_p = jax.random.split(key, 3)

    batch, input_dim = 8, 16
    x = jax.random.normal(k_x, (batch, input_dim), jnp.float32)
    params = init_params(k_p, input_dim)

    # Small single-tile case.
    out = ann_forward(x, params)
    out = jax.block_until_ready(out)
    ref = reference_forward(x, params)
    assert out.shape == (batch, 1)
    # bf16 input/weight cast -> loosened tolerance vs pure-f32 reference.
    assert jnp.allclose(out, ref, atol=2e-2, rtol=2e-2)

    # Multi-tile case with B not divisible by the tile (exercises grid,
    # padding, parallel axis).
    batch2 = 1000
    x2 = jax.random.normal(k_x2, (batch2, input_dim), jnp.float32)
    out2 = ann_forward(x2, params, tb=256)
    out2 = jax.block_until_ready(out2)
    ref2 = reference_forward(x2, params)
    assert out2.shape == (batch2, 1)
    assert jnp.allclose(out2, ref2, atol=2e-2, rtol=2e-2)

    print("KERNEL_OK")
</pallas_src>

<mosaic_0001>
module attributes {stable_mosaic.version = 11 : i64} {
  func.func @ann_kernel(%arg0: i32, %arg1: memref<16x16xbf16, #tpu.memory_space<vmem>>, %arg2: memref<16x64xbf16, #tpu.memory_space<vmem>>, %arg3: memref<2x64xf32, #tpu.memory_space<vmem>>, %arg4: memref<64x32xbf16, #tpu.memory_space<vmem>>, %arg5: memref<3x32xf32, #tpu.memory_space<vmem>>, %arg6: memref<1x1xf32, #tpu.memory_space<smem>>, %arg7: memref<16x1xf32, #tpu.memory_space<vmem>>) attributes {dimension_semantics = [#tpu.dimension_semantics<parallel>], iteration_bounds = array<i64: 1>, scalar_prefetch = 0 : i64, scratch_operands = 0 : i64, tpu.core_type = #tpu.core_type<tc>, window_params = [{transform_indices = @transform_0, window_bounds = array<i64: 16, 16>}, {pipeline_mode = #tpu.pipeline_mode<synchronous>, transform_indices = @transform_1, window_bounds = array<i64: 16, 64>}, {pipeline_mode = #tpu.pipeline_mode<synchronous>, transform_indices = @transform_2, window_bounds = array<i64: 2, 64>}, {pipeline_mode = #tpu.pipeline_mode<synchronous>, transform_indices = @transform_3, window_bounds = array<i64: 64, 32>}, {pipeline_mode = #tpu.pipeline_mode<synchronous>, transform_indices = @transform_4, window_bounds = array<i64: 3, 32>}, {transform_indices = @transform_5, window_bounds = array<i64: 1, 1>}, {transform_indices = @transform_6, window_bounds = array<i64: 16, 1>}]} {
    %c0 = arith.constant 0 : index
    %c0_0 = arith.constant 0 : index
    %0 = vector.load %arg1[%c0, %c0_0] : memref<16x16xbf16, #tpu.memory_space<vmem>>, vector<16x16xbf16>
    %c0_1 = arith.constant 0 : index
    %c0_2 = arith.constant 0 : index
    %1 = vector.load %arg2[%c0_1, %c0_2] : memref<16x64xbf16, #tpu.memory_space<vmem>>, vector<16x64xbf16>
    %cst = arith.constant dense<0.000000e+00> : vector<16x64xf32>
    %2 = tpu.matmul %0, %1, %cst {dimension_numbers = #tpu.dot_dimension_numbers<[1], [0], [0], [1], [0, 0, 1, 1], [], []>} : vector<16x16xbf16>, vector<16x64xbf16>, vector<16x64xf32> -> vector<16x64xf32>
    %c0_3 = arith.constant 0 : index
    %c0_4 = arith.constant 0 : index
    %3 = vector.load %arg3[%c0_3, %c0_4] : memref<2x64xf32, #tpu.memory_space<vmem>>, vector<1x64xf32>
    %4 = vector.broadcast %3 : vector<1x64xf32> to vector<16x64xf32>
    %5 = arith.mulf %2, %4 : vector<16x64xf32>
    %c1 = arith.constant 1 : index
    %c0_5 = arith.constant 0 : index
    %6 = vector.load %arg3[%c1, %c0_5] : memref<2x64xf32, #tpu.memory_space<vmem>>, vector<1x64xf32>
    %7 = vector.broadcast %6 : vector<1x64xf32> to vector<16x64xf32>
    %8 = arith.addf %5, %7 : vector<16x64xf32>
    %cst_6 = arith.constant 0.000000e+00 : f32
    %9 = vector.broadcast %cst_6 : f32 to vector<16x64xf32>
    %10 = arith.maximumf %8, %9 : vector<16x64xf32>
    %11 = arith.truncf %10 : vector<16x64xf32> to vector<16x64xbf16>
    %c0_7 = arith.constant 0 : index
    %c0_8 = arith.constant 0 : index
    %12 = vector.load %arg4[%c0_7, %c0_8] : memref<64x32xbf16, #tpu.memory_space<vmem>>, vector<64x32xbf16>
    %cst_9 = arith.constant dense<0.000000e+00> : vector<16x32xf32>
    %13 = tpu.matmul %11, %12, %cst_9 {dimension_numbers = #tpu.dot_dimension_numbers<[1], [0], [0], [1], [0, 0, 1, 1], [], []>} : vector<16x64xbf16>, vector<64x32xbf16>, vector<16x32xf32> -> vector<16x32xf32>
    %c0_10 = arith.constant 0 : index
    %c0_11 = arith.constant 0 : index
    %14 = vector.load %arg5[%c0_10, %c0_11] : memref<3x32xf32, #tpu.memory_space<vmem>>, vector<1x32xf32>
    %15 = vector.broadcast %14 : vector<1x32xf32> to vector<16x32xf32>
    %16 = arith.mulf %13, %15 : vector<16x32xf32>
    %c1_12 = arith.constant 1 : index
    %c0_13 = arith.constant 0 : index
    %17 = vector.load %arg5[%c1_12, %c0_13] : memref<3x32xf32, #tpu.memory_space<vmem>>, vector<1x32xf32>
    %18 = vector.broadcast %17 : vector<1x32xf32> to vector<16x32xf32>
    %19 = arith.addf %16, %18 : vector<16x32xf32>
    %cst_14 = arith.constant 0.000000e+00 : f32
    %20 = vector.broadcast %cst_14 : f32 to vector<16x32xf32>
    %21 = arith.maximumf %19, %20 : vector<16x32xf32>
    %c2 = arith.constant 2 : index
    %c0_15 = arith.constant 0 : index
    %22 = vector.load %arg5[%c2, %c0_15] : memref<3x32xf32, #tpu.memory_space<vmem>>, vector<1x32xf32>
    %23 = vector.broadcast %22 : vector<1x32xf32> to vector<16x32xf32>
    %24 = arith.mulf %21, %23 : vector<16x32xf32>
    %cst_16 = arith.constant dense<0.000000e+00> : vector<16xf32>
    %25 = vector.multi_reduction <add>, %24, %cst_16 [1] : vector<16x32xf32> to vector<16xf32>
    %26 = vector.shape_cast %25 : vector<16xf32> to vector<16x1xf32>
    %c0_17 = arith.constant 0 : index
    %c0_18 = arith.constant 0 : index
    %27 = memref.load %arg6[%c0_17, %c0_18] : memref<1x1xf32, #tpu.memory_space<smem>>
    %28 = vector.broadcast %27 : f32 to vector<16x1xf32>
    %29 = arith.addf %26, %28 : vector<16x1xf32>
    %c0_19 = arith.constant 0 : index
    %c0_20 = arith.constant 0 : index
    %30 = vector.load %arg7[%c0_19, %c0_20] : memref<16x1xf32, #tpu.memory_space<vmem>>, vector<16x1xf32>
    tpu.vector_store %arg7[%c0_19, %c0_20], %29 {strides = array<i32>} : memref<16x1xf32, #tpu.memory_space<vmem>>, vector<16x1xf32>,
    return
  }
  func.func @transform_0(%arg0: i32) -> (i32, i32) {
    %c0_i32 = arith.constant 0 : i32
    %c0_i32_0 = arith.constant 0 : i32
    return %arg0, %c0_i32 : i32, i32
  }
  func.func @transform_1(%arg0: i32) -> (i32, i32) {
    %c0_i32 = arith.constant 0 : i32
    %c0_i32_0 = arith.constant 0 : i32
    %c0_i32_1 = arith.constant 0 : i32
    return %c0_i32, %c0_i32_0 : i32, i32
  }
  func.func @transform_2(%arg0: i32) -> (i32, i32) {
    %c0_i32 = arith.constant 0 : i32
    %c0_i32_0 = arith.constant 0 : i32
    %c0_i32_1 = arith.constant 0 : i32
    return %c0_i32, %c0_i32_0 : i32, i32
  }
  func.func @transform_3(%arg0: i32) -> (i32, i32) {
    %c0_i32 = arith.constant 0 : i32
    %c0_i32_0 = arith.constant 0 : i32
    %c0_i32_1 = arith.constant 0 : i32
    return %c0_i32, %c0_i32_0 : i32, i32
  }
  func.func @transform_4(%arg0: i32) -> (i32, i32) {
    %c0_i32 = arith.constant 0 : i32
    %c0_i32_0 = arith.constant 0 : i32
    %c0_i32_1 = arith.constant 0 : i32
    return %c0_i32, %c0_i32_0 : i32, i32
  }
  func.func @transform_5(%arg0: i32) -> (i32, i32) {
    %c0_i32 = arith.constant 0 : i32
    %c0_i32_0 = arith.constant 0 : i32
    %c0_i32_1 = arith.constant 0 : i32
    return %c0_i32, %c0_i32_0 : i32, i32
  }
  func.func @transform_6(%arg0: i32) -> (i32, i32) {
    %c0_i32 = arith.constant 0 : i32
    %c0_i32_0 = arith.constant 0 : i32
    return %arg0, %c0_i32 : i32, i32
  }
}

</mosaic_0001>

<bundles_post_ra>
// kernel: tpu_custom_call.1
= control target key start
LH: loop header
LB: loop body
LE: loop exit
PB: predicated region body
PF: predicated region fallthrough
CT: control target
= control target key end

     0   :  { %vm40_vm0 = vcmask 130048   ;;  %vm101_vm1 = vcmask 523264   ;;  %vm133_vm2 = vcmask 261120   ;;  %vm144_vm3 = vcmask 7168   ;;  %s265_s1 = inlined_call_operand.vmem [shape: bf16[16,64], index: 1, kind: input, shape index: {}]   ;;  %s266_s0 = inlined_call_operand.vmem [shape: bf16[16,16], index: 0, kind: input, shape index: {}]   ;;  %s267_s2 = inlined_call_operand.vmem [shape: f32[2,64], index: 2, kind: input, shape index: {}]   ;;  %s268_s4 = inlined_call_operand.vmem [shape: f32[3,32], index: 4, kind: input, shape index: {}]   ;;  %s269_s3 = inlined_call_operand.vmem [shape: bf16[64,32], index: 3, kind: input, shape index: {}]   ;;  %s270_s5 = inlined_call_operand.<no memory space> [shape: f32[1,1], index: 5, kind: input, shape index: {}]   ;;  %s271_s6 = inlined_call_operand.vmem [shape: f32[16,1], index: 6, kind: output, shape index: {}]  }
   0x1   :  { %v178_v0 = vld [vmem:[%s265_s1] sm:$0xff]  ;;  %v182_v2 = vld [vmem:[%s269_s3 + $0x18] sm:$0xff]  ;;  %v181_v3 = vld [vmem:[%s269_s3 + $0x10] sm:$0xff]  ;;  %v141_v32 = vstv %s270_s5 }
   0x2   :  { %v177_v1 = vld [vmem:[%s266_s0] sm:$0xff]  ;;  %51 = vmatpush.bf16.msra.mxu0 %v178_v0  ;;  %109 = vmatpush.bf16.msra.mxu1 %v182_v2  ;;  %v180_v4 = vld [vmem:[%s269_s3 + $0x8] sm:$0xff] }
   0x3   :  { %v179_v5 = vld [vmem:[%s269_s3] sm:$0xff] }
   0x4   :  { %v183_v7 = vld [vmem:[%s267_s2] ss:$0 sm:$0xff]  ;;  %v184_v9 = vld [vmem:[%s267_s2 + $0x1] ss:$0 sm:$0xff]  ;;  %v187_v22 = vld [vmem:[%s268_s4 + $0x2] ss:$0 sm:$0xff] }
   0x5   :  { %159 = vmatmul.msk.bf16.vlgmr.msra.gmra.mxu0 %vm40_vm0, %v177_v1  ;;  %v185_v17 = vld [vmem:[%s268_s4] ss:$0 sm:$0xff]  ;;  %v186_v18 = vld [vmem:[%s268_s4 + $0x1] ss:$0 sm:$0xff] }
   0x6   :  { %110 = vmatpush.bf16.msra.mxu1 %v181_v3 }
   0xa   :  { %111 = vmatpush.bf16.msra.mxu1 %v180_v4 }
   0xe   :  { %112 = vmatpush.bf16.msra.mxu1 %v179_v5 }
  0x82   :  { %v53_v6 = vpop.f32.mrf.mxu0 }
  0x83   :  { %v60_v8 = vmul.f32 %v183_v7, %v53_v6 }
  0x85   :  { %v64_v11 = vadd.f32 %v184_v9, %v60_v8 }
  0x87   :  { %v66_v14 = vmax.f32 %v64_v11, 0.0 }
  0x8a   :  { %v55_v10 = vpop.f32.mrf.mxu0 }
  0x8b   :  { %v61_v12 = vmul.f32 %v183_v7, %v55_v10 }
  0x8d   :  { %v65_v13 = vadd.f32 %v184_v9, %v61_v12 }
  0x8f   :  { %v67_v15 = vmax.f32 %v65_v13, 0.0 }
  0x91   :  { %v68_v16 = vpack.c.bf16 %v67_v15, %v66_v14 }
  0x93   :  { %176 = vmatmul.msk.bf16.vlgmr.msra.gmra.mxu1 %vm101_vm1, %v68_v16 }
 0x110   :  { %v114_v19 = vpop.f32.mrf.mxu1 }
 0x111   :  { %v121_v20 = vmul.f32 %v185_v17, %v114_v19 }
 0x113   :  { %v125_v21 = vadd.f32 %v186_v18, %v121_v20 }
 0x115   :  { %v127_v23 = vmax.f32 %v125_v21, 0.0 }
 0x117   :  { %v131_v24 = vmul.f32 %v187_v22, %v127_v23 }
 0x118   :  { %v116_v25 = vpop.f32.mrf.mxu1 }
 0x119   :  { %v122_v26 = vmul.f32 %v185_v17, %v116_v25  ;;  %v134_v27 = vsel %vm133_vm2, %v131_v24, 0.0 }
 0x11a   :  { %135 = vadd.xlane.f32.xlu0 %v134_v27 }
 0x11b   :  { %v126_v28 = vadd.f32 %v186_v18, %v122_v26 }
 0x11d   :  { %v128_v29 = vmax.f32 %v126_v28, 0.0 }
 0x11f   :  { %v132_v30 = vmul.f32 %v187_v22, %v128_v29 }
 0x121   :  { %v137_v31 = vsel %vm133_vm2, %v132_v30, 0.0 }
 0x122   :  { %138 = vadd.xlane.f32.xlu0 %v137_v31 }
 0x18d   :  { %v136_v33 = vpop.xlane.xlu0 %135 }
 0x18e   :  { %v142_v34 = vadd.f32 %v141_v32, %v136_v33 }
 0x190   :  { %145 = vst.msk [vmem:[%s271_s6] sm:$0xff] %vm144_vm3, %v142_v34 }
 0x195   :  { %v139_v35 = vpop.xlane.xlu0 %138 }
 0x196   :  { %v143_v36 = vadd.f32 %v141_v32, %v139_v35 }
 0x198   :  { %146 = vst.msk [vmem:[%s271_s6 + $0x8] sm:$0xff] %vm144_vm3, %v143_v36 }

</bundles_post_ra>
